<compile_context>
chip_gen: v7x
topology: tpu7x:2x2x1
jax: 0.10.0
libtpu: 0.0.40
codegen_flags: <defaults>
</compile_context>

<pallas_src>
import functools

import jax
import jax.numpy as jnp
from jax.experimental import pallas as pl
from jax.experimental.pallas import tpu as pltpu

LANE = 128
_VMEM_LIMIT = 32 * 1024 * 1024  # explicit scoped-VMEM budget, safe on v5e/v6e/v7x


def _round_up(x, m):
    return ((x + m - 1) // m) * m


def _pick_tile(n, target, align):
    """Largest tile <= target that divides n and is a multiple of `align`;
    falls back to the full dimension (always legal for a BlockSpec)."""
    if n <= target:
        return n
    t = (target // align) * align
    while t >= align:
        if n % t == 0:
            return t
        t -= align
    return n


# ---------------------------------------------------------------------------
# Kernel 1: row-tiled dense feature transform  O = act(X @ W + b)
# W and b stay resident in VMEM across the whole grid (index_map ignores i).
# ---------------------------------------------------------------------------
def _matmul_kernel(x_ref, w_ref, b_ref, o_ref, *, apply_relu):
    acc = jnp.dot(x_ref[...], w_ref[...], preferred_element_type=jnp.float32)
    acc = acc + b_ref[...]
    if apply_relu:
        acc = jnp.maximum(acc, 0.0)
    o_ref[...] = acc.astype(o_ref.dtype)


def matmul_bias_act(x, w, b, *, apply_relu):
    m, k = x.shape
    n = w.shape[1]
    tm = _pick_tile(m, 512, 8)
    return pl.pallas_call(
        functools.partial(_matmul_kernel, apply_relu=apply_relu),
        out_shape=jax.ShapeDtypeStruct((m, n), jnp.float32),
        grid_spec=pltpu.PrefetchScalarGridSpec(
            num_scalar_prefetch=0,
            grid=(m // tm,),
            in_specs=[
                pl.BlockSpec((tm, k), lambda i: (i, 0)),
                pl.BlockSpec((k, n), lambda i: (0, 0)),
                pl.BlockSpec((1, n), lambda i: (0, 0)),
            ],
            out_specs=pl.BlockSpec((tm, n), lambda i: (i, 0)),
        ),
        compiler_params=pltpu.CompilerParams(
            dimension_semantics=("parallel",),
            vmem_limit_bytes=_VMEM_LIMIT,
        ),
    )(x, w, b.reshape(1, n))


# ---------------------------------------------------------------------------
# Kernel 2: per-graph neighborhood aggregation  O[g] = act(A_hat[g] @ H[g] + b)
# Tiled over (graph, output rows, reduction over node columns of A) with an
# f32 VMEM accumulator; bias + activation applied only in the finalize step.
# ---------------------------------------------------------------------------
def _agg_kernel(a_ref, h_ref, b_ref, o_ref, acc_ref, *, apply_relu):
    k = pl.program_id(2)

    @pl.when(k == 0)
    def _():
        acc_ref[...] = jnp.zeros_like(acc_ref)

    # bf16 x bf16 MXU matmul with f32 accumulation.
    acc_ref[...] += jnp.dot(
        a_ref[0], h_ref[0].astype(jnp.bfloat16),
        preferred_element_type=jnp.float32)

    @pl.when(k == pl.num_programs(2) - 1)
    def _():
        out = acc_ref[...] + b_ref[...]
        if apply_relu:
            out = jnp.maximum(out, 0.0)
        o_ref[0] = out.astype(o_ref.dtype)


def aggregate(a_hat, h, b, *, apply_relu):
    bsz, n, _ = a_hat.shape
    f = h.shape[-1]
    tm = _pick_tile(n, 512, 16)    # output-row tile (sublane aligned for bf16 A)
    tk = _pick_tile(n, 1024, 128)  # reduction tile (lane aligned)
    return pl.pallas_call(
        functools.partial(_agg_kernel, apply_relu=apply_relu),
        out_shape=jax.ShapeDtypeStruct((bsz, n, f), jnp.float32),
        grid_spec=pltpu.PrefetchScalarGridSpec(
            num_scalar_prefetch=0,
            grid=(bsz, n // tm, n // tk),
            in_specs=[
                pl.BlockSpec((1, tm, tk), lambda g, i, k: (g, i, k)),
                pl.BlockSpec((1, tk, f), lambda g, i, k: (g, k, 0)),
                pl.BlockSpec((1, f), lambda g, i, k: (0, 0)),
            ],
            out_specs=pl.BlockSpec((1, tm, f), lambda g, i, k: (g, i, 0)),
            scratch_shapes=[pltpu.VMEM((tm, f), jnp.float32)],
        ),
        compiler_params=pltpu.CompilerParams(
            dimension_semantics=("parallel", "parallel", "arbitrary"),
            vmem_limit_bytes=_VMEM_LIMIT,
        ),
    )(a_hat, h, b.reshape(1, f))


# ---------------------------------------------------------------------------
# One GCNConv layer + ReLU:  relu(A_hat @ H @ W + b)
# Contraction order picked so the N^2 aggregation runs over the narrower width.
# ---------------------------------------------------------------------------
def gcn_layer(a_hat, h, w, b):
    bsz, n, f_in = h.shape
    f_out = w.shape[1]
    if f_out <= f_in:
        # transform first: aggregate over f_out columns.
        hw = matmul_bias_act(h.reshape(bsz * n, f_in), w,
                             jnp.zeros((f_out,), jnp.float32), apply_relu=False)
        return aggregate(a_hat, hw.reshape(bsz, n, f_out), b, apply_relu=True)
    else:
        # aggregate first: aggregate over f_in columns.
        ah = aggregate(a_hat, h, jnp.zeros((f_in,), jnp.float32),
                       apply_relu=False)
        out = matmul_bias_act(ah.reshape(bsz * n, f_in), w, b, apply_relu=True)
        return out.reshape(bsz, n, f_out)


# ---------------------------------------------------------------------------
# Normalized adjacency per graph: D^-1/2 (A + I) D^-1/2, stacked (B, n, n),
# streamed as bf16 for the MXU (values are normalized degrees; bf16 is ample).
# ---------------------------------------------------------------------------
def build_normalized_adjacency(edge_index, batch_size, num_nodes):
    src, dst = edge_index[0], edge_index[1]
    g = dst // num_nodes
    a = jnp.zeros((batch_size, num_nodes, num_nodes), jnp.float32)
    a = a.at[g, dst % num_nodes, src % num_nodes].add(1.0)
    a = a + jnp.eye(num_nodes, dtype=jnp.float32)[None]
    deg = jnp.sum(a, axis=2)
    d_inv_sqrt = jnp.where(deg > 0, jax.lax.rsqrt(deg), 0.0)
    a = a * d_inv_sqrt[:, :, None] * d_inv_sqrt[:, None, :]
    return a.astype(jnp.bfloat16)


# ---------------------------------------------------------------------------
# Parameters (glorot-uniform W, zero bias, matching PyG GCNConv) + lane padding
# ---------------------------------------------------------------------------
def init_gcn_params(key, input_dim, hidden_dim, output_dim, num_layers):
    dims = []
    for i in range(num_layers):
        f_in = input_dim if i == 0 else hidden_dim
        f_out = output_dim if i == num_layers - 1 else hidden_dim
        dims.append((f_in, f_out))
    params = []
    for f_in, f_out in dims:
        key, wk = jax.random.split(key)
        limit = (6.0 / (f_in + f_out)) ** 0.5
        w = jax.random.uniform(wk, (f_in, f_out), jnp.float32, -limit, limit)
        b = jnp.zeros((f_out,), jnp.float32)
        params.append((w, b))
    return params


def _pad_params_to_lanes(params, input_dim):
    """Zero-pad W/b so each layer's output width is a multiple of 128 lanes.
    Padded activation columns stay exactly zero (zero W cols + zero bias +
    ReLU), so live columns are bit-identical to the unpadded math."""
    padded = []
    f_phys = input_dim
    for (w, b) in params:
        f_in, f_out = w.shape
        f_out_p = _round_up(f_out, LANE)
        w_p = jnp.zeros((f_phys, f_out_p), jnp.float32).at[:f_in, :f_out].set(w)
        b_p = jnp.zeros((f_out_p,), jnp.float32).at[:f_out].set(b)
        padded.append((w_p, b_p))
        f_phys = f_out_p
    return padded


# ---------------------------------------------------------------------------
# Forward pass (mirrors GCN.forward; inference: dropout = identity)
# ---------------------------------------------------------------------------
def gcn_forward(params, x, edge_index, batch, *, batch_size=None):
    if batch_size is None:
        # TODO(synk): fallback forces a device->host sync; prefer passing
        # batch_size as a static int so the whole forward stays jit-able.
        batch_size = int(jax.device_get(batch).max()) + 1
    num_features = x.shape[1]
    num_nodes = x.shape[0] // batch_size

    x_last = x.reshape(batch_size, num_nodes, num_features)[:, :, -1]

    a_hat = build_normalized_adjacency(edge_index, batch_size, num_nodes)
    padded_params = _pad_params_to_lanes(params, num_features)

    h = x.reshape(batch_size, num_nodes, num_features)
    for (w, b) in padded_params:
        # ReLU applied inside the kernels for every layer (incl. the last,
        # matching the reference). Dropout is identity at inference time.
        h = gcn_layer(a_hat, h, w, b)

    # True output_dim of the last layer is 1 -> real output lives in lane 0.
    x_res = h[:, :, 0]
    return x_res + x_last


# ---------------------------------------------------------------------------
# Demo
# ---------------------------------------------------------------------------
if __name__ == "__main__":
    key = jax.random.PRNGKey(0)

    batch_size = 2
    num_nodes = 16
    input_dim = 8          # per-node feature dim (the "time steps")
    hidden_dim = 32
    output_dim = 1         # forward reshapes last layer to (B, num_nodes)
    num_layers = 3

    n_total = batch_size * num_nodes

    key, xk = jax.random.split(key)
    x = jax.random.normal(xk, (n_total, input_dim), jnp.float32)

    batch = jnp.repeat(jnp.arange(batch_size, dtype=jnp.int32), num_nodes)

    # deterministic graph: a bidirectional ring within each graph of the batch
    srcs, dsts = [], []
    for gid in range(batch_size):
        off = gid * num_nodes
        for i in range(num_nodes):
            j = (i + 1) % num_nodes
            srcs += [off + i, off + j]
            dsts += [off + j, off + i]
    edge_index = jnp.array([srcs, dsts], dtype=jnp.int32)

    params = init_gcn_params(key, input_dim, hidden_dim, output_dim, num_layers)

    fwd = jax.jit(functools.partial(gcn_forward, batch_size=batch_size))
    out = jax.block_until_ready(fwd(params, x, edge_index, batch))

    assert out.shape == (batch_size, num_nodes)
    assert bool(jnp.all(jnp.isfinite(out)))
    print("KERNEL_OK")
</pallas_src>

<mosaic_0001>
module attributes {stable_mosaic.version = 11 : i64} {
  func.func private @main(%arg0: i32) attributes {dimension_semantics = [#tpu.dimension_semantics<core_parallel>], iteration_bounds = array<i64: 2>, tpu.core_type = #tpu.core_type<sc_scalar_subcore>, window_params = []} {
    return
  }
}

module attributes {stable_mosaic.version = 11 : i64} {
  func.func private @main(%arg0: i32) attributes {dimension_semantics = [#tpu.dimension_semantics<core_parallel>], iteration_bounds = array<i64: 2>, tpu.core_type = #tpu.core_type<sc_scalar_subcore>, window_params = []} {
    return
  }
}

module attributes {stable_mosaic.version = 11 : i64} {
  func.func @_matmul_kernel(%arg0: i32, %arg1: memref<32x8xf32, #tpu.memory_space<vmem>>, %arg2: memref<8x128xf32, #tpu.memory_space<vmem>>, %arg3: memref<1x128xf32, #tpu.memory_space<vmem>>, %arg4: memref<32x128xf32, #tpu.memory_space<vmem>>) attributes {dimension_semantics = [#tpu.dimension_semantics<parallel>], iteration_bounds = array<i64: 1>, scalar_prefetch = 0 : i64, scratch_operands = 0 : i64, tpu.core_type = #tpu.core_type<tc>, window_params = [{transform_indices = @transform_0, window_bounds = array<i64: 32, 8>}, {pipeline_mode = #tpu.pipeline_mode<synchronous>, transform_indices = @transform_1, window_bounds = array<i64: 8, 128>}, {pipeline_mode = #tpu.pipeline_mode<synchronous>, transform_indices = @transform_2, window_bounds = array<i64: 1, 128>}, {transform_indices = @transform_3, window_bounds = array<i64: 32, 128>}]} {
    %c0 = arith.constant 0 : index
    %c0_0 = arith.constant 0 : index
    %0 = vector.load %arg1[%c0, %c0_0] : memref<32x8xf32, #tpu.memory_space<vmem>>, vector<32x8xf32>
    %c0_1 = arith.constant 0 : index
    %c0_2 = arith.constant 0 : index
    %1 = vector.load %arg2[%c0_1, %c0_2] : memref<8x128xf32, #tpu.memory_space<vmem>>, vector<8x128xf32>
    %cst = arith.constant dense<0.000000e+00> : vector<32x128xf32>
    %2 = tpu.matmul %0, %1, %cst {dimension_numbers = #tpu.dot_dimension_numbers<[1], [0], [0], [1], [0, 0, 1, 1], [], []>} : vector<32x8xf32>, vector<8x128xf32>, vector<32x128xf32> -> vector<32x128xf32>
    %c0_3 = arith.constant 0 : index
    %c0_4 = arith.constant 0 : index
    %3 = vector.load %arg3[%c0_3, %c0_4] : memref<1x128xf32, #tpu.memory_space<vmem>>, vector<1x128xf32>
    %4 = vector.broadcast %3 : vector<1x128xf32> to vector<32x128xf32>
    %5 = arith.addf %2, %4 : vector<32x128xf32>
    %cst_5 = arith.constant 0.000000e+00 : f32
    %6 = vector.broadcast %cst_5 : f32 to vector<32x128xf32>
    %7 = arith.maximumf %5, %6 : vector<32x128xf32>
    %c0_6 = arith.constant 0 : index
    %c0_7 = arith.constant 0 : index
    %8 = vector.load %arg4[%c0_6, %c0_7] : memref<32x128xf32, #tpu.memory_space<vmem>>, vector<32x128xf32>
    tpu.vector_store %arg4[%c0_6, %c0_7], %7 {strides = array<i32>} : memref<32x128xf32, #tpu.memory_space<vmem>>, vector<32x128xf32>,
    return
  }
  func.func @transform_0(%arg0: i32) -> (i32, i32) {
    %c0_i32 = arith.constant 0 : i32
    %c0_i32_0 = arith.constant 0 : i32
    return %arg0, %c0_i32 : i32, i32
  }
  func.func @transform_1(%arg0: i32) -> (i32, i32) {
    %c0_i32 = arith.constant 0 : i32
    %c0_i32_0 = arith.constant 0 : i32
    %c0_i32_1 = arith.constant 0 : i32
    return %c0_i32, %c0_i32_0 : i32, i32
  }
  func.func @transform_2(%arg0: i32) -> (i32, i32) {
    %c0_i32 = arith.constant 0 : i32
    %c0_i32_0 = arith.constant 0 : i32
    %c0_i32_1 = arith.constant 0 : i32
    return %c0_i32, %c0_i32_0 : i32, i32
  }
  func.func @transform_3(%arg0: i32) -> (i32, i32) {
    %c0_i32 = arith.constant 0 : i32
    %c0_i32_0 = arith.constant 0 : i32
    return %arg0, %c0_i32 : i32, i32
  }
}

module attributes {stable_mosaic.version = 11 : i64} {
  func.func @_agg_kernel(%arg0: i32, %arg1: i32, %arg2: i32, %arg3: memref<1x16x16xbf16, #tpu.memory_space<vmem>>, %arg4: memref<1x16x8xf32, #tpu.memory_space<vmem>>, %arg5: memref<1x8xf32, #tpu.memory_space<vmem>>, %arg6: memref<1x16x8xf32, #tpu.memory_space<vmem>>, %arg7: memref<16x8xf32, #tpu.memory_space<vmem>>) attributes {dimension_semantics = [#tpu.dimension_semantics<parallel>, #tpu.dimension_semantics<parallel>, #tpu.dimension_semantics<arbitrary>], iteration_bounds = array<i64: 2, 1, 1>, scalar_prefetch = 0 : i64, scratch_operands = 1 : i64, tpu.core_type = #tpu.core_type<tc>, window_params = [{transform_indices = @transform_0, window_bounds = array<i64: 1, 16, 16>}, {transform_indices = @transform_1, window_bounds = array<i64: 1, 16, 8>}, {pipeline_mode = #tpu.pipeline_mode<synchronous>, transform_indices = @transform_2, window_bounds = array<i64: 1, 8>}, {transform_indices = @transform_3, window_bounds = array<i64: 1, 16, 8>}]} {
    %c0_i32 = arith.constant 0 : i32
    %0 = arith.cmpi eq, %arg2, %c0_i32 : i32
    %1 = arith.extui %0 : i1 to i32
    %c0_i32_0 = arith.constant 0 : i32
    %2 = arith.cmpi ne, %1, %c0_i32_0 : i32
    scf.if %2 {
      %cst_12 = arith.constant 0.000000e+00 : f32
      %15 = vector.broadcast %cst_12 : f32 to vector<16x8xf32>
      %c0_13 = arith.constant 0 : index
      %c0_14 = arith.constant 0 : index
      %16 = vector.load %arg7[%c0_13, %c0_14] : memref<16x8xf32, #tpu.memory_space<vmem>>, vector<16x8xf32>
      tpu.vector_store %arg7[%c0_13, %c0_14], %15 {strides = array<i32>} : memref<16x8xf32, #tpu.memory_space<vmem>>, vector<16x8xf32>,
    } else {
    }
    %c0 = arith.constant 0 : index
    %c0_1 = arith.constant 0 : index
    %3 = vector.load %arg7[%c0, %c0_1] : memref<16x8xf32, #tpu.memory_space<vmem>>, vector<16x8xf32>
    %c0_2 = arith.constant 0 : index
    %c0_3 = arith.constant 0 : index
    %c0_4 = arith.constant 0 : index
    %4 = vector.load %arg3[%c0_2, %c0_3, %c0_4] : memref<1x16x16xbf16, #tpu.memory_space<vmem>>, vector<1x16x16xbf16>
    %5 = vector.shape_cast %4 : vector<1x16x16xbf16> to vector<16x16xbf16>
    %c0_5 = arith.constant 0 : index
    %c0_6 = arith.constant 0 : index
    %c0_7 = arith.constant 0 : index
    %6 = vector.load %arg4[%c0_5, %c0_6, %c0_7] : memref<1x16x8xf32, #tpu.memory_space<vmem>>, vector<1x16x8xf32>
    %7 = vector.shape_cast %6 : vector<1x16x8xf32> to vector<16x8xf32>
    %8 = arith.truncf %7 : vector<16x8xf32> to vector<16x8xbf16>
    %cst = arith.constant dense<0.000000e+00> : vector<16x8xf32>
    %9 = tpu.matmul %5, %8, %cst {dimension_numbers = #tpu.dot_dimension_numbers<[1], [0], [0], [1], [0, 0, 1, 1], [], []>} : vector<16x16xbf16>, vector<16x8xbf16>, vector<16x8xf32> -> vector<16x8xf32>
    %10 = arith.addf %3, %9 : vector<16x8xf32>
    %c0_8 = arith.constant 0 : index
    %c0_9 = arith.constant 0 : index
    %11 = vector.load %arg7[%c0_8, %c0_9] : memref<16x8xf32, #tpu.memory_space<vmem>>, vector<16x8xf32>
    tpu.vector_store %arg7[%c0_8, %c0_9], %10 {strides = array<i32>} : memref<16x8xf32, #tpu.memory_space<vmem>>, vector<16x8xf32>,
    %c0_i32_10 = arith.constant 0 : i32
    %12 = arith.cmpi eq, %arg2, %c0_i32_10 : i32
    %13 = arith.extui %12 : i1 to i32
    %c0_i32_11 = arith.constant 0 : i32
    %14 = arith.cmpi ne, %13, %c0_i32_11 : i32
    scf.if %14 {
      %c0_12 = arith.constant 0 : index
      %c0_13 = arith.constant 0 : index
      %15 = vector.load %arg7[%c0_12, %c0_13] : memref<16x8xf32, #tpu.memory_space<vmem>>, vector<16x8xf32>
      %c0_14 = arith.constant 0 : index
      %c0_15 = arith.constant 0 : index
      %16 = vector.load %arg5[%c0_14, %c0_15] : memref<1x8xf32, #tpu.memory_space<vmem>>, vector<1x8xf32>
      %17 = vector.broadcast %16 : vector<1x8xf32> to vector<16x8xf32>
      %18 = arith.addf %15, %17 : vector<16x8xf32>
      %c0_16 = arith.constant 0 : index
      %c0_17 = arith.constant 0 : index
      %c0_18 = arith.constant 0 : index
      %19 = vector.load %arg6[%c0_16, %c0_17, %c0_18] : memref<1x16x8xf32, #tpu.memory_space<vmem>>, vector<1x16x8xf32>
      %20 = vector.shape_cast %19 : vector<1x16x8xf32> to vector<16x8xf32>
      %21 = vector.shape_cast %18 : vector<16x8xf32> to vector<1x16x8xf32>
      tpu.vector_store %arg6[%c0_16, %c0_17, %c0_18], %21 {strides = array<i32>} : memref<1x16x8xf32, #tpu.memory_space<vmem>>, vector<1x16x8xf32>,
    } else {
    }
    return
  }
  func.func @transform_0(%arg0: i32, %arg1: i32, %arg2: i32) -> (i32, i32, i32) {
    %c0_i32 = arith.constant 0 : i32
    return %arg0, %arg1, %arg2 : i32, i32, i32
  }
  func.func @transform_1(%arg0: i32, %arg1: i32, %arg2: i32) -> (i32, i32, i32) {
    %c0_i32 = arith.constant 0 : i32
    %c0_i32_0 = arith.constant 0 : i32
    return %arg0, %arg2, %c0_i32 : i32, i32, i32
  }
  func.func @transform_2(%arg0: i32, %arg1: i32, %arg2: i32) -> (i32, i32) {
    %c0_i32 = arith.constant 0 : i32
    %c0_i32_0 = arith.constant 0 : i32
    %c0_i32_1 = arith.constant 0 : i32
    return %c0_i32, %c0_i32_0 : i32, i32
  }
  func.func @transform_3(%arg0: i32, %arg1: i32, %arg2: i32) -> (i32, i32, i32) {
    %c0_i32 = arith.constant 0 : i32
    %c0_i32_0 = arith.constant 0 : i32
    return %arg0, %arg1, %c0_i32 : i32, i32, i32
  }
}

module attributes {stable_mosaic.version = 11 : i64} {
  func.func @_matmul_kernel(%arg0: i32, %arg1: memref<32x128xf32, #tpu.memory_space<vmem>>, %arg2: memref<128x128xf32, #tpu.memory_space<vmem>>, %arg3: memref<1x128xf32, #tpu.memory_space<vmem>>, %arg4: memref<32x128xf32, #tpu.memory_space<vmem>>) attributes {dimension_semantics = [#tpu.dimension_semantics<parallel>], iteration_bounds = array<i64: 1>, scalar_prefetch = 0 : i64, scratch_operands = 0 : i64, tpu.core_type = #tpu.core_type<tc>, window_params = [{transform_indices = @transform_0, window_bounds = array<i64: 32, 128>}, {pipeline_mode = #tpu.pipeline_mode<synchronous>, transform_indices = @transform_1, window_bounds = array<i64: 128, 128>}, {pipeline_mode = #tpu.pipeline_mode<synchronous>, transform_indices = @transform_2, window_bounds = array<i64: 1, 128>}, {transform_indices = @transform_3, window_bounds = array<i64: 32, 128>}]} {
    %c0 = arith.constant 0 : index
    %c0_0 = arith.constant 0 : index
    %0 = vector.load %arg1[%c0, %c0_0] : memref<32x128xf32, #tpu.memory_space<vmem>>, vector<32x128xf32>
    %c0_1 = arith.constant 0 : index
    %c0_2 = arith.constant 0 : index
    %1 = vector.load %arg2[%c0_1, %c0_2] : memref<128x128xf32, #tpu.memory_space<vmem>>, vector<128x128xf32>
    %cst = arith.constant dense<0.000000e+00> : vector<32x128xf32>
    %2 = tpu.matmul %0, %1, %cst {dimension_numbers = #tpu.dot_dimension_numbers<[1], [0], [0], [1], [0, 0, 1, 1], [], []>} : vector<32x128xf32>, vector<128x128xf32>, vector<32x128xf32> -> vector<32x128xf32>
    %c0_3 = arith.constant 0 : index
    %c0_4 = arith.constant 0 : index
    %3 = vector.load %arg3[%c0_3, %c0_4] : memref<1x128xf32, #tpu.memory_space<vmem>>, vector<1x128xf32>
    %4 = vector.broadcast %3 : vector<1x128xf32> to vector<32x128xf32>
    %5 = arith.addf %2, %4 : vector<32x128xf32>
    %c0_5 = arith.constant 0 : index
    %c0_6 = arith.constant 0 : index
    %6 = vector.load %arg4[%c0_5, %c0_6] : memref<32x128xf32, #tpu.memory_space<vmem>>, vector<32x128xf32>
    tpu.vector_store %arg4[%c0_5, %c0_6], %5 {strides = array<i32>} : memref<32x128xf32, #tpu.memory_space<vmem>>, vector<32x128xf32>,
    return
  }
  func.func @transform_0(%arg0: i32) -> (i32, i32) {
    %c0_i32 = arith.constant 0 : i32
    %c0_i32_0 = arith.constant 0 : i32
    return %arg0, %c0_i32 : i32, i32
  }
  func.func @transform_1(%arg0: i32) -> (i32, i32) {
    %c0_i32 = arith.constant 0 : i32
    %c0_i32_0 = arith.constant 0 : i32
    %c0_i32_1 = arith.constant 0 : i32
    return %c0_i32, %c0_i32_0 : i32, i32
  }
  func.func @transform_2(%arg0: i32) -> (i32, i32) {
    %c0_i32 = arith.constant 0 : i32
    %c0_i32_0 = arith.constant 0 : i32
    %c0_i32_1 = arith.constant 0 : i32
    return %c0_i32, %c0_i32_0 : i32, i32
  }
  func.func @transform_3(%arg0: i32) -> (i32, i32) {
    %c0_i32 = arith.constant 0 : i32
    %c0_i32_0 = arith.constant 0 : i32
    return %arg0, %c0_i32 : i32, i32
  }
}

module attributes {stable_mosaic.version = 11 : i64} {
  func.func @_agg_kernel(%arg0: i32, %arg1: i32, %arg2: i32, %arg3: memref<1x16x16xbf16, #tpu.memory_space<vmem>>, %arg4: memref<1x16x128xf32, #tpu.memory_space<vmem>>, %arg5: memref<1x128xf32, #tpu.memory_space<vmem>>, %arg6: memref<1x16x128xf32, #tpu.memory_space<vmem>>, %arg7: memref<16x128xf32, #tpu.memory_space<vmem>>) attributes {dimension_semantics = [#tpu.dimension_semantics<parallel>, #tpu.dimension_semantics<parallel>, #tpu.dimension_semantics<arbitrary>], iteration_bounds = array<i64: 2, 1, 1>, scalar_prefetch = 0 : i64, scratch_operands = 1 : i64, tpu.core_type = #tpu.core_type<tc>, window_params = [{transform_indices = @transform_0, window_bounds = array<i64: 1, 16, 16>}, {transform_indices = @transform_1, window_bounds = array<i64: 1, 16, 128>}, {pipeline_mode = #tpu.pipeline_mode<synchronous>, transform_indices = @transform_2, window_bounds = array<i64: 1, 128>}, {transform_indices = @transform_3, window_bounds = array<i64: 1, 16, 128>}]} {
    %c0_i32 = arith.constant 0 : i32
    %0 = arith.cmpi eq, %arg2, %c0_i32 : i32
    %1 = arith.extui %0 : i1 to i32
    %c0_i32_0 = arith.constant 0 : i32
    %2 = arith.cmpi ne, %1, %c0_i32_0 : i32
    scf.if %2 {
      %cst_12 = arith.constant 0.000000e+00 : f32
      %15 = vector.broadcast %cst_12 : f32 to vector<16x128xf32>
      %c0_13 = arith.constant 0 : index
      %c0_14 = arith.constant 0 : index
      %16 = vector.load %arg7[%c0_13, %c0_14] : memref<16x128xf32, #tpu.memory_space<vmem>>, vector<16x128xf32>
      tpu.vector_store %arg7[%c0_13, %c0_14], %15 {strides = array<i32>} : memref<16x128xf32, #tpu.memory_space<vmem>>, vector<16x128xf32>,
    } else {
    }
    %c0 = arith.constant 0 : index
    %c0_1 = arith.constant 0 : index
    %3 = vector.load %arg7[%c0, %c0_1] : memref<16x128xf32, #tpu.memory_space<vmem>>, vector<16x128xf32>
    %c0_2 = arith.constant 0 : index
    %c0_3 = arith.constant 0 : index
    %c0_4 = arith.constant 0 : index
    %4 = vector.load %arg3[%c0_2, %c0_3, %c0_4] : memref<1x16x16xbf16, #tpu.memory_space<vmem>>, vector<1x16x16xbf16>
    %5 = vector.shape_cast %4 : vector<1x16x16xbf16> to vector<16x16xbf16>
    %c0_5 = arith.constant 0 : index
    %c0_6 = arith.constant 0 : index
    %c0_7 = arith.constant 0 : index
    %6 = vector.load %arg4[%c0_5, %c0_6, %c0_7] : memref<1x16x128xf32, #tpu.memory_space<vmem>>, vector<1x16x128xf32>
    %7 = vector.shape_cast %6 : vector<1x16x128xf32> to vector<16x128xf32>
    %8 = arith.truncf %7 : vector<16x128xf32> to vector<16x128xbf16>
    %cst = arith.constant dense<0.000000e+00> : vector<16x128xf32>
    %9 = tpu.matmul %5, %8, %cst {dimension_numbers = #tpu.dot_dimension_numbers<[1], [0], [0], [1], [0, 0, 1, 1], [], []>} : vector<16x16xbf16>, vector<16x128xbf16>, vector<16x128xf32> -> vector<16x128xf32>
    %10 = arith.addf %3, %9 : vector<16x128xf32>
    %c0_8 = arith.constant 0 : index
    %c0_9 = arith.constant 0 : index
    %11 = vector.load %arg7[%c0_8, %c0_9] : memref<16x128xf32, #tpu.memory_space<vmem>>, vector<16x128xf32>
    tpu.vector_store %arg7[%c0_8, %c0_9], %10 {strides = array<i32>} : memref<16x128xf32, #tpu.memory_space<vmem>>, vector<16x128xf32>,
    %c0_i32_10 = arith.constant 0 : i32
    %12 = arith.cmpi eq, %arg2, %c0_i32_10 : i32
    %13 = arith.extui %12 : i1 to i32
    %c0_i32_11 = arith.constant 0 : i32
    %14 = arith.cmpi ne, %13, %c0_i32_11 : i32
    scf.if %14 {
      %c0_12 = arith.constant 0 : index
      %c0_13 = arith.constant 0 : index
      %15 = vector.load %arg7[%c0_12, %c0_13] : memref<16x128xf32, #tpu.memory_space<vmem>>, vector<16x128xf32>
      %c0_14 = arith.constant 0 : index
      %c0_15 = arith.constant 0 : index
      %16 = vector.load %arg5[%c0_14, %c0_15] : memref<1x128xf32, #tpu.memory_space<vmem>>, vector<1x128xf32>
      %17 = vector.broadcast %16 : vector<1x128xf32> to vector<16x128xf32>
      %18 = arith.addf %15, %17 : vector<16x128xf32>
      %cst_16 = arith.constant 0.000000e+00 : f32
      %19 = vector.broadcast %cst_16 : f32 to vector<16x128xf32>
      %20 = arith.maximumf %18, %19 : vector<16x128xf32>
      %c0_17 = arith.constant 0 : index
      %c0_18 = arith.constant 0 : index
      %c0_19 = arith.constant 0 : index
      %21 = vector.load %arg6[%c0_17, %c0_18, %c0_19] : memref<1x16x128xf32, #tpu.memory_space<vmem>>, vector<1x16x128xf32>
      %22 = vector.shape_cast %21 : vector<1x16x128xf32> to vector<16x128xf32>
      %23 = vector.shape_cast %20 : vector<16x128xf32> to vector<1x16x128xf32>
      tpu.vector_store %arg6[%c0_17, %c0_18, %c0_19], %23 {strides = array<i32>} : memref<1x16x128xf32, #tpu.memory_space<vmem>>, vector<1x16x128xf32>,
    } else {
    }
    return
  }
  func.func @transform_0(%arg0: i32, %arg1: i32, %arg2: i32) -> (i32, i32, i32) {
    %c0_i32 = arith.constant 0 : i32
    return %arg0, %arg1, %arg2 : i32, i32, i32
  }
  func.func @transform_1(%arg0: i32, %arg1: i32, %arg2: i32) -> (i32, i32, i32) {
    %c0_i32 = arith.constant 0 : i32
    %c0_i32_0 = arith.constant 0 : i32
    return %arg0, %arg2, %c0_i32 : i32, i32, i32
  }
  func.func @transform_2(%arg0: i32, %arg1: i32, %arg2: i32) -> (i32, i32) {
    %c0_i32 = arith.constant 0 : i32
    %c0_i32_0 = arith.constant 0 : i32
    %c0_i32_1 = arith.constant 0 : i32
    return %c0_i32, %c0_i32_0 : i32, i32
  }
  func.func @transform_3(%arg0: i32, %arg1: i32, %arg2: i32) -> (i32, i32, i32) {
    %c0_i32 = arith.constant 0 : i32
    %c0_i32_0 = arith.constant 0 : i32
    return %arg0, %arg1, %c0_i32 : i32, i32, i32
  }
}

</mosaic_0001>

<bundles_post_ra>
// kernel: gcn_forward.6
= control target key start
LH: loop header
LB: loop body
LE: loop exit
PB: predicated region body
PF: predicated region fallthrough
CT: control target
= control target key end

     0   :  { %s561_s12 = smov 0   ;;  %s563_s13 = smov 0   ;;  %s606_s0 = inlined_call_operand.vmem [shape: bf16[2,16,16], index: 0, kind: input, shape index: {}]   ;;  %s607_s1 = inlined_call_operand.vmem [shape: f32[2,16,8], index: 1, kind: input, shape index: {}]   ;;  %s608_s2 = inlined_call_operand.vmem [shape: f32[1,8], index: 2, kind: input, shape index: {}]   ;;  %s609_s3 = inlined_call_operand.vmem [shape: f32[2,16,8], index: 3, kind: output, shape index: {}]  }
   0x1   :  { %s565_s14 = smov 0  }
   0x2 LB: > { %s32_s15 = sadd.s32 1, %s533_s13  ;;  %p465_p0 = scmp.ge.s32.totalorder %s537_s14, 1  ;;  %s537_s14 = sphi %s565_s14, %s13_s14   ;;  %s533_s13 = sphi %s563_s13, %s611_s13   ;;  %s529_s12 = sphi %s561_s12, %s610_s12  }
   0x3   : > { %p34_p1 = scmp.ge.s32.totalorder %s32_s15, 2  ;;  %p187_p2 = scmp.lt.s32.totalorder %s537_s14, 3 }
   0x5   : > { %s613_s15 = smov (%p34_p1, %s32_s15), 0  ;;  %p188_p3 = pnand %p465_p0, %p187_p2 }
   0x6   : > { %vm269_vm0 = vcmask (!%p188_p3), 64512   ;;  %p232_p4 = scmp.lt.s32.totalorder (!%p188_p3), %s529_s12, 1  ;;  %v539_v0 = vmov (!%p188_p3), 0.0   ;;  %vm540_vm1 = vmmov (!%p188_p3), 0   ;;  %vm284_vm2 = vcmask (!%p188_p3), 130048  }
   0x7   : > { %191 = sbr.rel (%p188_p3) target bundleno = 250 (0xfa), region = 32  ;;  %270 = vst.msk [vmem:[#allocation2] sm:$0xff] (!%p188_p3), %vm269_vm0, %v539_v0  ;;  %271 = vst.msk [vmem:[#allocation2 + $0x8] sm:$0xff] (!%p188_p3), %vm269_vm0, %v539_v0  ;;  %482 = vmatprep.subr.bf16.mxu0 (!%p188_p3), %v539_v0  ;;  %484 = vmatprep.mubr.msk.bf16.mxu0 (!%p188_p3), %vm540_vm1, %v539_v0  ;;  %v474_v13 = vld [vmem:[%s608_s2] ss:$0 sm:$0xff] (!%p188_p3) }
   0xe   : > { %s615_s12 = smov (!%p232_p4, %s529_s12), 1  ;;  %v272_v5 = vld [vmem:[#allocation2] sm:$0xff]  ;;  %v273_v7 = vld [vmem:[#allocation2 + $0x8] sm:$0xff] }
   0xf   : > { %s477_s16 = sshll.u32 %s615_s12, 3  ;;  %s478_s17 = sshll.u32 %s615_s12, 4 }
  0x10   : > { %s242_s20 = scalar_lea.vmem %s606_s0, %s477_s16  ;;  %s252_s23 = scalar_lea.vmem %s607_s1, %s478_s17 }
  0x11   : > { %v276_v1 = vld [vmem:[%s252_s23] sm:$0xff]  ;;  %v277_v2 = vld [vmem:[%s252_s23 + $0x8] sm:$0xff]  ;;  %s262_s28 = scalar_lea.vmem %s609_s3, %s478_s17 }
  0x12   : > { %v278_v3 = vpack.c.bf16 %v277_v2, %v276_v1  ;;  %v514_v4 = vld [vmem:[%s242_s20] sm:$0xff]  }
  0x14   : > { %483 = vmatpush3.bf16.msra.mxu0 %v278_v3 }
  0x17   : > { %485 = vmatmul.mubr.msk.bf16.vlgmr.msra.gmra.mrb[0].mxu0 %vm284_vm2, %v514_v4 }
  0xea   : > { %v322_v6 = vpop.f32.mrb[0].mxu0 }
  0xeb   : > { %v329_v8 = vadd.f32 %v322_v6, %v272_v5  ;;  %v486_v9 = vpop.f32.mrb[1].mxu0 }
  0xec   : > { %v325_v10 = vpop.f32.mrb[2].mxu0 }
  0xed   : > { %332 = vst.msk [vmem:[#allocation2] sm:$0xff] %vm269_vm0, %v329_v8  ;;  %v330_v11 = vadd.f32 %v325_v10, %v273_v7  ;;  %v487_v12 = vpop.f32.mrb[3].mxu0 }
  0xef   : > { %333 = vst.msk [vmem:[#allocation2 + $0x8] sm:$0xff] %vm269_vm0, %v330_v11 }
  0xf4   : > { %v337_v14 = vld [vmem:[#allocation2] sm:$0xff] }
  0xf5   : > { %v346_v15 = vadd.f32 %v474_v13, %v337_v14 }
  0xf6   : > { %v338_v16 = vld [vmem:[#allocation2 + $0x8] sm:$0xff] }
  0xf7   : > { %348 = vst.msk [vmem:[%s262_s28] sm:$0xff] %vm269_vm0, %v346_v15  ;;  %v347_v17 = vadd.f32 %v474_v13, %v338_v16 }
  0xf9   : > { %349 = vst.msk [vmem:[%s262_s28 + $0x8] sm:$0xff] %vm269_vm0, %v347_v17 }
  0xfa PF: > { %s13_s14 = sadd.s32 1, %s537_s14   ;;  %s610_s12 = smov %s533_s13 }
  0xfb   : > { %p10_p5 = scmp.ge.s32.totalorder %s13_s14, 4   ;;  %s611_s13 = smov %s613_s15 }
  0xfd   :  { %12 = sbr.rel (!%p10_p5) target bundleno = 2 (0x2), region = 73 }

// kernel: gcn_forward.7
= control target key start
LH: loop header
LB: loop body
LE: loop exit
PB: predicated region body
PF: predicated region fallthrough
CT: control target
= control target key end

     0   :  { %vm26_vm0 = vcmask 64512   ;;  %s206_s1 = inlined_call_operand.vmem [shape: f32[8,128], index: 1, kind: input, shape index: {}]   ;;  %s207_s0 = inlined_call_operand.vmem [shape: f32[32,8], index: 0, kind: input, shape index: {}]   ;;  %s208_s2 = inlined_call_operand.vmem [shape: f32[1,128], index: 2, kind: input, shape index: {}]   ;;  %s209_s3 = inlined_call_operand.vmem [shape: f32[32,128], index: 3, kind: output, shape index: {}]  }
   0x1   :  { %v18_v0 = vld [vmem:[%s206_s1] sm:$0xff]  ;;  %v16_v2 = vld [vmem:[%s207_s0 + $0x10] sm:$0xff]  ;;  %v15_v3 = vld [vmem:[%s207_s0 + $0x8] sm:$0xff] }
   0x2   :  { %v14_v1 = vld [vmem:[%s207_s0] sm:$0xff]  ;;  %146 = vmatprep.subr.mxu0 %v18_v0  ;;  %154 = vmatprep.subr.mxu1 %v18_v0  ;;  %v17_v4 = vld [vmem:[%s207_s0 + $0x18] sm:$0xff] }
   0x3   :  { %147 = vmatpush3.msra.mxu0 %v18_v0  ;;  %155 = vmatpush3.msra.mxu1 %v18_v0  ;;  %v136_v5 = vld [vmem:[%s208_s2] ss:$0 sm:$0xff] }
   0x4   :  { %148 = vmatprep.mubr.msk.f32.mxu0 %vm26_vm0, %v14_v1  ;;  %151 = vmatprep.mubr.msk.f32.mxu1 %vm26_vm0, %v16_v2 }
   0x5   :  { %149 = vmatmul.mubr.msk.f32.vlgmr.msra.gmra.mrb[0].mxu0 %vm26_vm0, %v15_v3  ;;  %152 = vmatmul.mubr.msk.f32.vlgmr.msra.gmra.mrb[0].mxu1 %vm26_vm0, %v17_v4 }
  0xd8   :  { %v150_v6 = vpop.f32.mrb[0].mxu0  ;;  %v153_v7 = vpop.f32.mrb[0].mxu1 }
  0xd9   :  { %v111_v8 = vadd.f32 %v150_v6, %v136_v5  ;;  %v121_v9 = vadd.f32 %v153_v7, %v136_v5  ;;  %v105_v10 = vpop.f32.mrb[1].mxu0  ;;  %v115_v11 = vpop.f32.mrb[1].mxu1 }
  0xda   :  { %v106_v12 = vadd.f32 %v136_v5, %v105_v10  ;;  %v116_v13 = vadd.f32 %v136_v5, %v115_v11 }
  0xdb   :  { %v125_v14 = vmax.f32 %v111_v8, 0.0  ;;  %v127_v15 = vmax.f32 %v121_v9, 0.0 }
  0xdc   :  { %v124_v16 = vmax.f32 %v106_v12, 0.0  ;;  %v126_v17 = vmax.f32 %v116_v13, 0.0 }
  0xdd   :  { %129 = vst [vmem:[%s209_s3 + $0x8] sm:$0xff] %v125_v14  ;;  %131 = vst [vmem:[%s209_s3 + $0x18] sm:$0xff] %v127_v15 }
  0xde   :  { %128 = vst [vmem:[%s209_s3] sm:$0xff] %v124_v16  ;;  %130 = vst [vmem:[%s209_s3 + $0x10] sm:$0xff] %v126_v17 }

// kernel: gcn_forward.8
= control target key start
LH: loop header
LB: loop body
LE: loop exit
PB: predicated region body
PF: predicated region fallthrough
CT: control target
= control target key end

     0   :  { %s336_s1 = inlined_call_operand.vmem [shape: f32[128,128], index: 1, kind: input, shape index: {}]   ;;  %s337_s0 = inlined_call_operand.vmem [shape: f32[32,128], index: 0, kind: input, shape index: {}]   ;;  %s338_s2 = inlined_call_operand.vmem [shape: f32[1,128], index: 2, kind: input, shape index: {}]   ;;  %s339_s3 = inlined_call_operand.vmem [shape: f32[32,128], index: 3, kind: output, shape index: {}]  }
   0x1   :  { %v18_v0 = vld [vmem:[%s336_s1] sm:$0xff]  ;;  %v19_v1 = vld [vmem:[%s336_s1 + $0x8] sm:$0xff]  ;;  %v20_v2 = vld [vmem:[%s336_s1 + $0x10] sm:$0xff] }
   0x2   :  { %v193_v3 = vpack.c.bf16 %v19_v1, %v18_v0  ;;  %v21_v4 = vld [vmem:[%s336_s1 + $0x18] sm:$0xff]  ;;  %v22_v6 = vld [vmem:[%s336_s1 + $0x20] sm:$0xff]  ;;  %v23_v7 = vld [vmem:[%s336_s1 + $0x28] sm:$0xff] }
   0x3   :  { %v197_v5 = vpack.c.bf16 %v21_v4, %v20_v2  ;;  %v201_v8 = vpack.c.bf16 %v23_v7, %v22_v6  ;;  %v14_v9 = vld [vmem:[%s337_s0] sm:$0xff]  ;;  %v16_v10 = vld [vmem:[%s337_s0 + $0x10] sm:$0xff]  ;;  %v25_v12 = vld [vmem:[%s336_s1 + $0x38] sm:$0xff] }
   0x4   :  { %194 = vmatprep.subr.bf16.mxu0 %v193_v3  ;;  %225 = vmatprep.subr.bf16.mxu1 %v193_v3  ;;  %v24_v11 = vld [vmem:[%s336_s1 + $0x30] sm:$0xff]  ;;  %v26_v14 = vld [vmem:[%s336_s1 + $0x40] sm:$0xff]  ;;  %v27_v15 = vld [vmem:[%s336_s1 + $0x48] sm:$0xff] }
   0x5   :  { %196 = vmatpush3.bf16.msra.mxu0 %v193_v3  ;;  %233 = vmatpush3.bf16.msra.mxu1 %v193_v3  ;;  %v205_v13 = vpack.c.bf16 %v25_v12, %v24_v11  ;;  %v209_v16 = vpack.c.bf16 %v27_v15, %v26_v14  ;;  %v28_v17 = vld [vmem:[%s336_s1 + $0x50] sm:$0xff]  ;;  %v29_v18 = vld [vmem:[%s336_s1 + $0x58] sm:$0xff]  ;;  %v30_v20 = vld [vmem:[%s336_s1 + $0x60] sm:$0xff] }
   0x6   :  { %198 = vmatprep.subr.bf16.mxu0 %v197_v5  ;;  %226 = vmatprep.subr.bf16.mxu1 %v197_v5  ;;  %v213_v19 = vpack.c.bf16 %v29_v18, %v28_v17  ;;  %v31_v21 = vld [vmem:[%s336_s1 + $0x68] sm:$0xff]  ;;  %v32_v23 = vld [vmem:[%s336_s1 + $0x70] sm:$0xff]  ;;  %v33_v24 = vld [vmem:[%s336_s1 + $0x78] sm:$0xff] }
   0x7   :  { %187 = vmatprep.mubr.f32.mxu0 %v14_v9  ;;  %190 = vmatprep.mubr.f32.mxu1 %v16_v10  ;;  %v217_v22 = vpack.c.bf16 %v31_v21, %v30_v20  ;;  %v221_v25 = vpack.c.bf16 %v33_v24, %v32_v23  ;;  %v15_v26 = vld [vmem:[%s337_s0 + $0x8] sm:$0xff]  ;;  %v17_v27 = vld [vmem:[%s337_s0 + $0x18] sm:$0xff]  ;;  %v134_v28 = vld [vmem:[%s338_s2] ss:$0 sm:$0xff] }
   0x9   :  { %200 = vmatpush3.bf16.msra.mxu0 %v197_v5  ;;  %234 = vmatpush3.bf16.msra.mxu1 %v197_v5 }
   0xa   :  { %202 = vmatprep.subr.bf16.mxu0 %v201_v8  ;;  %227 = vmatprep.subr.bf16.mxu1 %v201_v8 }
   0xd   :  { %204 = vmatpush3.bf16.msra.mxu0 %v201_v8  ;;  %235 = vmatpush3.bf16.msra.mxu1 %v201_v8 }
   0xe   :  { %206 = vmatprep.subr.bf16.mxu0 %v205_v13  ;;  %228 = vmatprep.subr.bf16.mxu1 %v205_v13 }
  0x11   :  { %208 = vmatpush3.bf16.msra.mxu0 %v205_v13  ;;  %236 = vmatpush3.bf16.msra.mxu1 %v205_v13 }
  0x12   :  { %210 = vmatprep.subr.bf16.mxu0 %v209_v16  ;;  %229 = vmatprep.subr.bf16.mxu1 %v209_v16 }
  0x15   :  { %212 = vmatpush3.bf16.msra.mxu0 %v209_v16  ;;  %237 = vmatpush3.bf16.msra.mxu1 %v209_v16 }
  0x16   :  { %214 = vmatprep.subr.bf16.mxu0 %v213_v19  ;;  %230 = vmatprep.subr.bf16.mxu1 %v213_v19 }
  0x19   :  { %216 = vmatpush3.bf16.msra.mxu0 %v213_v19  ;;  %238 = vmatpush3.bf16.msra.mxu1 %v213_v19 }
  0x1a   :  { %218 = vmatprep.subr.bf16.mxu0 %v217_v22  ;;  %231 = vmatprep.subr.bf16.mxu1 %v217_v22 }
  0x1d   :  { %220 = vmatpush3.bf16.msra.mxu0 %v217_v22  ;;  %239 = vmatpush3.bf16.msra.mxu1 %v217_v22 }
  0x1e   :  { %222 = vmatprep.subr.bf16.mxu0 %v221_v25  ;;  %232 = vmatprep.subr.bf16.mxu1 %v221_v25 }
  0x21   :  { %224 = vmatpush3.bf16.msra.mxu0 %v221_v25  ;;  %240 = vmatpush3.bf16.msra.mxu1 %v221_v25 }
  0x24   :  { %188 = vmatmul.mubr.f32.vlgmr.msra.gmra.mrb[0].mxu0 %v15_v26  ;;  %191 = vmatmul.mubr.f32.vlgmr.msra.gmra.mrb[0].mxu1 %v17_v27 }
  0xf7   :  { %v189_v29 = vpop.f32.mrb[0].mxu0  ;;  %v192_v30 = vpop.f32.mrb[0].mxu1 }
  0xf8   :  { %v113_v31 = vadd.f32 %v189_v29, %v134_v28  ;;  %v123_v32 = vadd.f32 %v192_v30, %v134_v28  ;;  %v107_v33 = vpop.f32.mrb[1].mxu0  ;;  %v117_v34 = vpop.f32.mrb[1].mxu1 }
  0xf9   :  { %v108_v35 = vadd.f32 %v134_v28, %v107_v33  ;;  %v118_v36 = vadd.f32 %v134_v28, %v117_v34 }
  0xfa   :  { %127 = vst [vmem:[%s339_s3 + $0x8] sm:$0xff] %v113_v31  ;;  %129 = vst [vmem:[%s339_s3 + $0x18] sm:$0xff] %v123_v32 }
  0xfb   :  { %126 = vst [vmem:[%s339_s3] sm:$0xff] %v108_v35  ;;  %128 = vst [vmem:[%s339_s3 + $0x10] sm:$0xff] %v118_v36 }

// kernel: gcn_forward.9
= control target key start
LH: loop header
LB: loop body
LE: loop exit
PB: predicated region body
PF: predicated region fallthrough
CT: control target
= control target key end

     0   :  { %s561_s12 = smov 0   ;;  %s563_s13 = smov 0   ;;  %s600_s0 = inlined_call_operand.vmem [shape: bf16[2,16,16], index: 0, kind: input, shape index: {}]   ;;  %s601_s1 = inlined_call_operand.vmem [shape: f32[2,16,128], index: 1, kind: input, shape index: {}]   ;;  %s602_s2 = inlined_call_operand.vmem [shape: f32[1,128], index: 2, kind: input, shape index: {}]   ;;  %s603_s3 = inlined_call_operand.vmem [shape: f32[2,16,128], index: 3, kind: output, shape index: {}]  }
   0x1   :  { %s565_s14 = smov 0  }
   0x2 LB: > { %s32_s15 = sadd.s32 1, %s533_s13  ;;  %p465_p0 = scmp.ge.s32.totalorder %s537_s14, 1  ;;  %s537_s14 = sphi %s565_s14, %s13_s14   ;;  %s533_s13 = sphi %s563_s13, %s605_s13   ;;  %s529_s12 = sphi %s561_s12, %s604_s12  }
   0x3   : > { %p34_p1 = scmp.ge.s32.totalorder %s32_s15, 2  ;;  %p187_p2 = scmp.lt.s32.totalorder %s537_s14, 3 }
   0x5   : > { %s607_s15 = smov (%p34_p1, %s32_s15), 0  ;;  %p188_p3 = pnand %p465_p0, %p187_p2 }
   0x6   : > { %p232_p4 = scmp.lt.s32.totalorder (!%p188_p3), %s529_s12, 1  ;;  %v539_v0 = vmov (!%p188_p3), 0.0   ;;  %vm540_vm0 = vmmov (!%p188_p3), 0   ;;  %vm283_vm1 = vcmask (!%p188_p3), 130048   ;;  %v474_v5 = vld [vmem:[%s602_s2] ss:$0 sm:$0xff] (!%p188_p3) }
   0x7   : > { %191 = sbr.rel (%p188_p3) target bundleno = 242 (0xf2), region = 32  ;;  %482 = vmatprep.subr.bf16.mxu0 (!%p188_p3), %v539_v0  ;;  %484 = vmatprep.mubr.msk.bf16.mxu0 (!%p188_p3), %vm540_vm0, %v539_v0 }
   0xe   : > { %s609_s12 = smov (!%p232_p4, %s529_s12), 1 }
   0xf   : > { %s477_s16 = sshll.u32 %s609_s12, 3  ;;  %s478_s17 = sshll.u32 %s609_s12, 4 }
  0x10   : > { %s242_s20 = scalar_lea.vmem %s600_s0, %s477_s16  ;;  %s252_s23 = scalar_lea.vmem %s601_s1, %s478_s17 }
  0x11   : > { %v275_v1 = vld [vmem:[%s252_s23] sm:$0xff]  ;;  %v276_v2 = vld [vmem:[%s252_s23 + $0x8] sm:$0xff]  ;;  %s262_s28 = scalar_lea.vmem %s603_s3, %s478_s17 }
  0x12   : > { %v277_v3 = vpack.c.bf16 %v276_v2, %v275_v1  ;;  %v514_v4 = vld [vmem:[%s242_s20] sm:$0xff]  }
  0x14   : > { %483 = vmatpush3.bf16.msra.mxu0 %v277_v3 }
  0x17   : > { %485 = vmatmul.mubr.msk.bf16.vlgmr.msra.gmra.mrb[0].mxu0 %vm283_vm1, %v514_v4 }
  0xea   : > { %v321_v6 = vpop.f32.mrb[0].mxu0 }
  0xeb   : > { %v344_v7 = vadd.f32 %v474_v5, %v321_v6  ;;  %v486_v8 = vpop.f32.mrb[1].mxu0 }
  0xec   : > { %v324_v9 = vpop.f32.mrb[2].mxu0 }
  0xed   : > { %v346_v10 = vmax.f32 %v344_v7, 0.0  ;;  %v345_v11 = vadd.f32 %v474_v5, %v324_v9  ;;  %v487_v12 = vpop.f32.mrb[3].mxu0 }
  0xef   : > { %348 = vst [vmem:[%s262_s28] sm:$0xff] %v346_v10  ;;  %v347_v13 = vmax.f32 %v345_v11, 0.0 }
  0xf1   : > { %349 = vst [vmem:[%s262_s28 + $0x8] sm:$0xff] %v347_v13 }
  0xf2 PF: > { %s13_s14 = sadd.s32 1, %s537_s14   ;;  %s604_s12 = smov %s533_s13 }
  0xf3   : > { %p10_p5 = scmp.ge.s32.totalorder %s13_s14, 4   ;;  %s605_s13 = smov %s607_s15 }
  0xf5   :  { %12 = sbr.rel (!%p10_p5) target bundleno = 2 (0x2), region = 73 }

</bundles_post_ra>
